<compile_context>
chip_gen: v7x
topology: tpu7x:2x2x1
jax: 0.10.0
libtpu: 0.0.40
codegen_flags: <defaults>
</compile_context>

<pallas_src>
import functools

import jax
import jax.numpy as jnp
from jax.experimental import pallas as pl
from jax.experimental.pallas import tpu as pltpu


# ---------------------------------------------------------------------------
# Generation-aware VMEM sizing
# ---------------------------------------------------------------------------

def _physical_vmem_bytes():
    """Physical VMEM per TensorCore (128 MiB on v5e/v6e, 64 MiB on v7x)."""
    try:
        info = pltpu.get_tpu_info()
        for attr in ("vmem_capacity_bytes", "vmem_bytes", "vmem_size_bytes"):
            val = getattr(info, attr, None)
            if val:
                return int(val)
    except Exception:
        pass
    # Conservative (v7x-sized) fallback if the query is unavailable.
    return 64 * 1024 * 1024


def _vmem_budget_bytes(phys):
    # Keep the steady-state pipeline working set to <= ~1/4 of physical VMEM:
    # 24 MiB on 128 MiB parts (v5e/v6e), 16 MiB on v7x's 64 MiB.  Floor 8 MiB.
    return max(8 << 20, min(24 << 20, phys // 4))


def _vmem_limit_bytes(phys):
    # Raise the scoped-VMEM limit above the conservative defaults (16 MiB on
    # v5e, 32 MiB elsewhere) while keeping ample headroom under physical.
    return int(min(max(phys // 2, 32 << 20), 128 << 20))


# ---------------------------------------------------------------------------
# Tile selection (VMEM-budget driven, models the f32 intermediates)
# ---------------------------------------------------------------------------

_Q_TILE_CANDIDATES = (512, 256, 128, 64, 32, 16, 8)
_K_TILE_CANDIDATES = (1024, 512, 256, 128, 64, 32, 16, 8)


def _divisor_candidates(extent, candidates):
    cands = [t for t in candidates if extent % t == 0]
    return cands if cands else [extent]   # full extent is always a legal block


def _choose_tiles_flash(Lq, Lk, D, Dv, H, in_itemsize, out_itemsize, budget):
    """(tile_q, tile_k) for the online-softmax kernel, sized to the budget."""

    def fits(tq, tk):
        dbuf_in = 2 * H * (tq * D + tk * D + tk * Dv) * in_itemsize
        dbuf_out = 2 * tq * H * Dv * out_itemsize
        # m / l scratch pad their unit minor dim out to a full 128-lane row.
        scratch = 4 * (2 * H * tq * 128 + H * tq * Dv)
        # f32 in-flight intermediates: scores + exp(scores) (+ slack) and PV.
        interm = 4 * (3 * H * tq * tk + H * tq * Dv)
        return dbuf_in + dbuf_out + scratch + interm <= budget

    q_cands = _divisor_candidates(Lq, _Q_TILE_CANDIDATES)
    k_cands = _divisor_candidates(Lk, _K_TILE_CANDIDATES)
    best = None
    for tq in q_cands:
        for tk in k_cands:
            if not fits(tq, tk):
                continue
            score = (min(tq, tk), tq * tk, tq)   # prefer balanced, then big
            if best is None or score > best[0]:
                best = (score, (tq, tk))
    if best is not None:
        return best[1]
    # TODO(synk): nothing fits the budget (enormous H*D); fall back to the
    # smallest tiles and rely on the raised scoped-VMEM limit.
    return q_cands[-1], k_cands[-1]


def _choose_tile_q_full_k(Lq, Lk, D, Dv, H, in_itemsize, out_itemsize,
                          attn_itemsize, budget):
    """Largest Lq tile for the attn-returning kernel (full Lk per step)."""

    def fits(tq):
        dbuf_in = 2 * H * (tq * D + Lk * D + Lk * Dv) * in_itemsize
        dbuf_out = 2 * (tq * H * Dv * out_itemsize + H * tq * Lk * attn_itemsize)
        interm = 4 * (3 * H * tq * Lk + H * tq * Dv)
        return dbuf_in + dbuf_out + interm <= budget

    q_cands = _divisor_candidates(Lq, _Q_TILE_CANDIDATES)
    for tq in q_cands:
        if fits(tq):
            return tq
    # TODO(synk): materializing the full (H, Lq, Lk) attention weights forces
    # the whole Lk extent resident; use return_attn=False for very long Lk.
    return q_cands[-1]


# ---------------------------------------------------------------------------
# Pallas kernels
# ---------------------------------------------------------------------------

def _sdpa_flash_kernel(q_ref, k_ref, v_ref, o_ref, m_scr, l_scr, acc_scr, *,
                       temperature):
    """Online-softmax attention, no attention-weights output.

    Blocks: q (1,H,TQ,D)  k (1,H,TK,D)  v (1,H,TK,Dv)  o (1,TQ,H*Dv)
    Grid:   (batch, q tiles, kv tiles) with the kv axis innermost/"arbitrary".
    """
    kv = pl.program_id(2)

    @pl.when(kv == 0)
    def _():
        m_scr[...] = jnp.full_like(m_scr, -jnp.inf)
        l_scr[...] = jnp.zeros_like(l_scr)
        acc_scr[...] = jnp.zeros_like(acc_scr)

    # Fold 1/temperature into q (TQ*D elements) instead of scaling the (TQ,TK)
    # score matrix: far fewer VALU ops.  Operands stay bf16 (MXU-native);
    # accumulation and softmax math are f32.
    q = q_ref[0] * jnp.asarray(1.0 / temperature, q_ref.dtype)
    k = k_ref[0]
    v = v_ref[0]

    # scores[h, i, j] = sum_d q[h, i, d] * k[h, j, d]; contraction on the
    # shared D axis directly -- no explicit k.T (XLU transpose) on the way in.
    s = jax.lax.dot_general(q, k, (((2,), (2,)), ((0,), (0,))),
                            preferred_element_type=jnp.float32)   # (H,TQ,TK)

    m_prev = m_scr[...]
    m_new = jnp.maximum(m_prev, jnp.max(s, axis=-1, keepdims=True))
    alpha = jnp.exp(m_prev - m_new)
    p = jnp.exp(s - m_new)
    l_scr[...] = alpha * l_scr[...] + jnp.sum(p, axis=-1, keepdims=True)
    m_scr[...] = m_new

    pv = jax.lax.dot_general(p.astype(v.dtype), v,
                             (((2,), (1,)), ((0,), (0,))),
                             preferred_element_type=jnp.float32)  # (H,TQ,Dv)
    acc_scr[...] = alpha * acc_scr[...] + pv

    # nn.Dropout(0.1) on attn: identity in eval mode.

    @pl.when(kv == pl.num_programs(2) - 1)
    def _():
        H, _, Dv = acc_scr.shape
        inv = pl.reciprocal(l_scr[...], approx=True)   # EUP slot, ~free
        out = acc_scr[...] * inv                        # (H, TQ, Dv), f32
        # Lane-dense (TQ, H*Dv) output slab: each head lands in its own lane
        # range, so the HBM writeback is one dense block and the wrapper needs
        # no head transpose afterwards.
        for h in range(H):
            o_ref[0, :, h * Dv:(h + 1) * Dv] = out[h].astype(o_ref.dtype)


def _sdpa_attn_kernel(q_ref, k_ref, v_ref, o_ref, attn_ref, *, temperature):
    """Attention that also materializes the softmax weights (full Lk / step).

    Blocks: q (1,H,TQ,D)  k (1,H,Lk,D)  v (1,H,Lk,Dv)
            o (1,TQ,H*Dv)  attn (1,H,TQ,Lk)
    """
    q = q_ref[0] * jnp.asarray(1.0 / temperature, q_ref.dtype)
    k = k_ref[0]
    v = v_ref[0]

    s = jax.lax.dot_general(q, k, (((2,), (2,)), ((0,), (0,))),
                            preferred_element_type=jnp.float32)   # (H,TQ,Lk)
    m = jnp.max(s, axis=-1, keepdims=True)
    e = jnp.exp(s - m)
    denom = jnp.sum(e, axis=-1, keepdims=True)
    # Exact divide for the exported weights (an approximate reciprocal would
    # leak ~1e-3 relative error into the public attn output).
    attn = e / denom
    attn_ref[0] = attn.astype(attn_ref.dtype)

    # nn.Dropout(0.1) on attn: identity in eval mode.

    pv = jax.lax.dot_general(attn.astype(v.dtype), v,
                             (((2,), (1,)), ((0,), (0,))),
                             preferred_element_type=jnp.float32)  # (H,TQ,Dv)
    H, _, Dv = pv.shape
    for h in range(H):
        o_ref[0, :, h * Dv:(h + 1) * Dv] = pv[h].astype(o_ref.dtype)


# ---------------------------------------------------------------------------
# Pallas scaled-dot-product attention wrapper
# ---------------------------------------------------------------------------

def scaled_dot_product_attention(q, k, v, mask=None, *, temperature,
                                 return_attn=False,
                                 out_dtype=jnp.float32,
                                 attn_dtype=jnp.float32,
                                 tile_q=None, tile_k=None):
    """Pallas TPU ScaledDotProductAttention.forward for (B, H, L, Dh) inputs.

    Returns (output, attn) where `output` is the lane-dense (B, Lq, H*Dv) slab
    (heads already merged -- the MultiHeadAttention wrapper consumes it
    directly, no transpose/reshape) and `attn` is None unless return_attn=True.
    `mask` is accepted and ignored: the PyTorch reference discards
    masked_fill's result, so masking is a no-op there too.  Pass
    attn_dtype=jnp.bfloat16 to halve the dominant attn HBM writeback.
    """
    del mask  # intentionally unused (matches the reference implementation)

    B, H, Lq, D = q.shape
    Bk, Hk, Lk, Dk = k.shape
    Bv, Hv, Lkv, Dv = v.shape
    assert (B, H) == (Bk, Hk) == (Bv, Hv) and D == Dk and Lk == Lkv

    in_itemsize = jnp.dtype(q.dtype).itemsize
    out_itemsize = jnp.dtype(out_dtype).itemsize
    attn_itemsize = jnp.dtype(attn_dtype).itemsize

    phys_vmem = _physical_vmem_bytes()
    budget = _vmem_budget_bytes(phys_vmem)
    vmem_limit = _vmem_limit_bytes(phys_vmem)

    flops = 2 * B * H * Lq * Lk * (D + Dv)
    transcendentals = B * H * Lq * Lk
    bytes_accessed = ((q.size + k.size + v.size) * in_itemsize
                      + B * Lq * H * Dv * out_itemsize)

    if return_attn:
        tq = tile_q if tile_q is not None else _choose_tile_q_full_k(
            Lq, Lk, D, Dv, H, in_itemsize, out_itemsize, attn_itemsize, budget)
        assert Lq % tq == 0, "tile_q must divide Lq"
        bytes_accessed += B * H * Lq * Lk * attn_itemsize

        kernel = functools.partial(_sdpa_attn_kernel,
                                   temperature=float(temperature))
        out, attn = pl.pallas_call(
            kernel,
            out_shape=(jax.ShapeDtypeStruct((B, Lq, H * Dv), out_dtype),
                       jax.ShapeDtypeStruct((B, H, Lq, Lk), attn_dtype)),
            grid_spec=pltpu.PrefetchScalarGridSpec(
                num_scalar_prefetch=0,
                grid=(B, Lq // tq),
                in_specs=[
                    pl.BlockSpec((1, H, tq, D), lambda b, i: (b, 0, i, 0)),
                    pl.BlockSpec((1, H, Lk, D), lambda b, i: (b, 0, 0, 0)),
                    pl.BlockSpec((1, H, Lk, Dv), lambda b, i: (b, 0, 0, 0)),
                ],
                out_specs=[
                    pl.BlockSpec((1, tq, H * Dv), lambda b, i: (b, i, 0)),
                    pl.BlockSpec((1, H, tq, Lk), lambda b, i: (b, 0, i, 0)),
                ],
            ),
            compiler_params=pltpu.CompilerParams(
                # Batch is the megacore axis; the q-tile axis is "arbitrary"
                # so the constant K/V block is not re-fetched per core.
                dimension_semantics=("parallel", "arbitrary"),
                vmem_limit_bytes=vmem_limit),
            cost_estimate=pl.CostEstimate(
                flops=flops, transcendentals=transcendentals,
                bytes_accessed=bytes_accessed),
        )(q, k, v)
        return out, attn

    # Fast path: flash-style online softmax over Lk tiles, no attn writeback.
    auto_tq, auto_tk = _choose_tiles_flash(Lq, Lk, D, Dv, H, in_itemsize,
                                           out_itemsize, budget)
    tq = tile_q if tile_q is not None else auto_tq
    tk = tile_k if tile_k is not None else auto_tk
    assert Lq % tq == 0 and Lk % tk == 0, "tiles must divide sequence lengths"

    kernel = functools.partial(_sdpa_flash_kernel,
                               temperature=float(temperature))
    out = pl.pallas_call(
        kernel,
        out_shape=jax.ShapeDtypeStruct((B, Lq, H * Dv), out_dtype),
        grid_spec=pltpu.PrefetchScalarGridSpec(
            num_scalar_prefetch=0,
            grid=(B, Lq // tq, Lk // tk),
            in_specs=[
                pl.BlockSpec((1, H, tq, D), lambda b, i, j: (b, 0, i, 0)),
                pl.BlockSpec((1, H, tk, D), lambda b, i, j: (b, 0, j, 0)),
                pl.BlockSpec((1, H, tk, Dv), lambda b, i, j: (b, 0, j, 0)),
            ],
            out_specs=pl.BlockSpec((1, tq, H * Dv), lambda b, i, j: (b, i, 0)),
            scratch_shapes=[
                pltpu.VMEM((H, tq, 1), jnp.float32),    # running max m
                pltpu.VMEM((H, tq, 1), jnp.float32),    # running sum l
                pltpu.VMEM((H, tq, Dv), jnp.float32),   # running PV acc
            ],
        ),
        compiler_params=pltpu.CompilerParams(
            dimension_semantics=("parallel", "parallel", "arbitrary"),
            vmem_limit_bytes=vmem_limit),
        cost_estimate=pl.CostEstimate(
            flops=flops, transcendentals=transcendentals,
            bytes_accessed=bytes_accessed),
    )(q, k, v)
    return out, None


# ---------------------------------------------------------------------------
# MultiHeadAttention forward (wrapper around the Pallas attention core)
# ---------------------------------------------------------------------------

def _init_params(key, d_model):
    """Matches the PyTorch module's reset_parameters (eval-relevant parts)."""
    k_qkv, k_out = jax.random.split(key)

    def xavier_uniform(k, out_f, in_f):
        bound = (6.0 / (in_f + out_f)) ** 0.5
        return jax.random.uniform(k, (out_f, in_f), jnp.float32, -bound, bound)

    return {
        "ln_w": jnp.ones((d_model,), jnp.float32),
        "ln_b": jnp.zeros((d_model,), jnp.float32),
        "qkv_w": xavier_uniform(k_qkv, 3 * d_model, d_model),
        "qkv_b": jnp.zeros((3 * d_model,), jnp.float32),
        "out_w": xavier_uniform(k_out, d_model, d_model),
        "out_b": jnp.zeros((d_model,), jnp.float32),
    }


def multi_head_attention(x, params, *, n_head, d_k, d_v, mask=None,
                         return_attn=True, attention_fn=None,
                         compute_dtype=jnp.bfloat16):
    """Forward pass of the PyTorch MultiHeadAttention module (eval mode)."""
    if attention_fn is None:
        attention_fn = scaled_dot_product_attention

    residual = x
    bs, seq_len, d_model = x.shape
    assert d_model == n_head * d_v

    # LayerNorm (nn.LayerNorm defaults: eps=1e-5, affine)
    mu = jnp.mean(x, axis=-1, keepdims=True)
    var = jnp.mean(jnp.square(x - mu), axis=-1, keepdims=True)
    xn = (x - mu) * jax.lax.rsqrt(var + 1e-5)
    xn = xn * params["ln_w"] + params["ln_b"]

    # qkv projection + the module's reshape / permute / chunk
    qkv = xn @ params["qkv_w"].T + params["qkv_b"]          # (bs, L, 3*d_model)
    qkv = qkv.reshape(bs, seq_len, n_head, 3 * d_v)
    qkv = jnp.transpose(qkv, (0, 2, 1, 3))                  # (bs, H, L, 3*d_v)
    q, k, v = jnp.split(qkv, 3, axis=-1)                    # each (bs, H, L, d_v)

    # The MXU is bf16-native on v5e/v6e/v7x: feed bf16 operands (half the
    # q/k/v DMA bytes, no multi-pass f32 MXU emulation); the kernel
    # accumulates in f32.
    q = q.astype(compute_dtype)
    k = k.astype(compute_dtype)
    v = v.astype(compute_dtype)

    # NOTE: the reference module's masked_fill result is discarded, so mask is
    # a no-op there; it is forwarded and ignored here to match that behavior.
    out, attn = attention_fn(q, k, v, mask=mask,
                             temperature=float(d_k) ** 0.5,
                             return_attn=return_attn)

    # `out` is already the lane-dense (bs, L, n_head*d_v) slab -- no head
    # transpose / reshape before the output projection.
    out = out @ params["out_w"].T + params["out_b"]
    # nn.Dropout(0.1) on the projection: identity in eval mode.
    out = out + residual
    return out, attn


# ---------------------------------------------------------------------------
# Pure-JAX reference (same inputs, exact f32 math) for correctness checking
# ---------------------------------------------------------------------------

def _sdpa_reference(q, k, v, mask=None, *, temperature, return_attn=True):
    del mask
    # Fold the scale into q in the input dtype exactly like the kernel does,
    # then compute the rest in exact f32.
    qs = (q * jnp.asarray(1.0 / temperature, q.dtype)).astype(jnp.float32)
    scores = jnp.einsum("bhqd,bhkd->bhqk", qs, k.astype(jnp.float32),
                        precision="highest")
    attn = jax.nn.softmax(scores, axis=-1)
    out = jnp.einsum("bhqk,bhkd->bhqd", attn, v.astype(jnp.float32),
                     precision="highest")
    B, H, Lq, Dv = out.shape
    out = jnp.transpose(out, (0, 2, 1, 3)).reshape(B, Lq, H * Dv)
    return out, (attn if return_attn else None)


if __name__ == "__main__":
    key = jax.random.PRNGKey(0)
    k_x, k_params = jax.random.split(key)

    # Small shapes consistent with the module: batch=2, seq=8, n_head=2,
    # d_k=d_v=16 -> d_model = n_head*d_v = 32.
    bs, seq_len, n_head, d_k, d_v = 2, 8, 2, 16, 16
    d_model = n_head * d_v

    x = jax.random.normal(k_x, (bs, seq_len, d_model), dtype=jnp.float32)
    params = _init_params(k_params, d_model)

    # attn-returning path (matches the PyTorch forward contract).
    out, attn = multi_head_attention(x, params, n_head=n_head, d_k=d_k,
                                     d_v=d_v, return_attn=True)
    jax.block_until_ready((out, attn))

    out_ref, attn_ref = multi_head_attention(
        x, params, n_head=n_head, d_k=d_k, d_v=d_v, return_attn=True,
        attention_fn=_sdpa_reference)

    assert jnp.allclose(out, out_ref, atol=1e-2, rtol=1e-2), "output mismatch"
    assert jnp.allclose(attn, attn_ref, atol=1e-2, rtol=1e-2), "attn mismatch"

    # Fast inference path: flash-style kernel, no attn HBM writeback.
    out_fast, attn_fast = multi_head_attention(
        x, params, n_head=n_head, d_k=d_k, d_v=d_v, return_attn=False)
    jax.block_until_ready(out_fast)
    assert attn_fast is None
    assert jnp.allclose(out_fast, out_ref, atol=1e-2, rtol=1e-2), \
        "fast-path mismatch"

    # Exercise the online-softmax accumulation across multiple q/kv tiles
    # (grid 2x2x2) on a still-small standalone attention call.
    kq, kk, kv = jax.random.split(jax.random.PRNGKey(1), 3)
    q2 = jax.random.normal(kq, (2, 2, 16, 16), jnp.float32).astype(jnp.bfloat16)
    k2 = jax.random.normal(kk, (2, 2, 16, 16), jnp.float32).astype(jnp.bfloat16)
    v2 = jax.random.normal(kv, (2, 2, 16, 16), jnp.float32).astype(jnp.bfloat16)
    out_tiled, _ = scaled_dot_product_attention(
        q2, k2, v2, temperature=float(d_k) ** 0.5, return_attn=False,
        tile_q=8, tile_k=8)
    jax.block_until_ready(out_tiled)
    out_tiled_ref, _ = _sdpa_reference(
        q2, k2, v2, temperature=float(d_k) ** 0.5, return_attn=False)
    assert jnp.allclose(out_tiled, out_tiled_ref, atol=1e-2, rtol=1e-2), \
        "tiled flash-path mismatch"

    print("KERNEL_OK")
</pallas_src>

<mosaic_0001>
module attributes {stable_mosaic.version = 11 : i64} {
  func.func @_sdpa_attn_kernel(%arg0: i32, %arg1: i32, %arg2: memref<1x2x8x16xbf16, #tpu.memory_space<vmem>>, %arg3: memref<1x2x8x16xbf16, #tpu.memory_space<vmem>>, %arg4: memref<1x2x8x16xbf16, #tpu.memory_space<vmem>>, %arg5: memref<1x8x32xf32, #tpu.memory_space<vmem>>, %arg6: memref<1x2x8x8xf32, #tpu.memory_space<vmem>>) attributes {dimension_semantics = [#tpu.dimension_semantics<parallel>, #tpu.dimension_semantics<arbitrary>], iteration_bounds = array<i64: 2, 1>, scalar_prefetch = 0 : i64, scratch_operands = 0 : i64, tpu.core_type = #tpu.core_type<tc>, window_params = [{transform_indices = @transform_0, window_bounds = array<i64: 1, 2, 8, 16>}, {transform_indices = @transform_1, window_bounds = array<i64: 1, 2, 8, 16>}, {transform_indices = @transform_2, window_bounds = array<i64: 1, 2, 8, 16>}, {transform_indices = @transform_3, window_bounds = array<i64: 1, 8, 32>}, {transform_indices = @transform_4, window_bounds = array<i64: 1, 2, 8, 8>}]} {
    %c0 = arith.constant 0 : index
    %c0_0 = arith.constant 0 : index
    %c0_1 = arith.constant 0 : index
    %c0_2 = arith.constant 0 : index
    %0 = vector.load %arg2[%c0, %c0_0, %c0_1, %c0_2] : memref<1x2x8x16xbf16, #tpu.memory_space<vmem>>, vector<1x2x8x16xbf16>
    %1 = vector.shape_cast %0 : vector<1x2x8x16xbf16> to vector<2x8x16xbf16>
    %cst = arith.constant 2.500000e-01 : bf16
    %2 = vector.broadcast %cst : bf16 to vector<2x8x16xbf16>
    %3 = arith.mulf %1, %2 : vector<2x8x16xbf16>
    %c0_3 = arith.constant 0 : index
    %c0_4 = arith.constant 0 : index
    %c0_5 = arith.constant 0 : index
    %c0_6 = arith.constant 0 : index
    %4 = vector.load %arg3[%c0_3, %c0_4, %c0_5, %c0_6] : memref<1x2x8x16xbf16, #tpu.memory_space<vmem>>, vector<1x2x8x16xbf16>
    %5 = vector.shape_cast %4 : vector<1x2x8x16xbf16> to vector<2x8x16xbf16>
    %c0_7 = arith.constant 0 : index
    %c0_8 = arith.constant 0 : index
    %c0_9 = arith.constant 0 : index
    %c0_10 = arith.constant 0 : index
    %6 = vector.load %arg4[%c0_7, %c0_8, %c0_9, %c0_10] : memref<1x2x8x16xbf16, #tpu.memory_space<vmem>>, vector<1x2x8x16xbf16>
    %7 = vector.shape_cast %6 : vector<1x2x8x16xbf16> to vector<2x8x16xbf16>
    %cst_11 = arith.constant dense<0.000000e+00> : vector<2x8x8xf32>
    %8 = tpu.matmul %3, %5, %cst_11 {dimension_numbers = #tpu.dot_dimension_numbers<[2], [2], [1], [1], [0, 0, 0, 1, 1, 1], [0], [0]>} : vector<2x8x16xbf16>, vector<2x8x16xbf16>, vector<2x8x8xf32> -> vector<2x8x8xf32>
    %cst_12 = arith.constant dense<0xFF800000> : vector<2x8xf32>
    %9 = vector.multi_reduction <maximumf>, %8, %cst_12 [2] : vector<2x8x8xf32> to vector<2x8xf32>
    %10 = vector.shape_cast %9 : vector<2x8xf32> to vector<2x8x1xf32>
    %11 = vector.broadcast %10 : vector<2x8x1xf32> to vector<2x8x8xf32>
    %12 = arith.subf %8, %11 : vector<2x8x8xf32>
    %13 = math.exp %12 : vector<2x8x8xf32>
    %cst_13 = arith.constant dense<0.000000e+00> : vector<2x8xf32>
    %14 = vector.multi_reduction <add>, %13, %cst_13 [2] : vector<2x8x8xf32> to vector<2x8xf32>
    %15 = vector.shape_cast %14 : vector<2x8xf32> to vector<2x8x1xf32>
    %16 = vector.broadcast %15 : vector<2x8x1xf32> to vector<2x8x8xf32>
    %17 = arith.divf %13, %16 : vector<2x8x8xf32>
    %c0_14 = arith.constant 0 : index
    %c0_15 = arith.constant 0 : index
    %c0_16 = arith.constant 0 : index
    %c0_17 = arith.constant 0 : index
    %18 = vector.load %arg6[%c0_14, %c0_15, %c0_16, %c0_17] : memref<1x2x8x8xf32, #tpu.memory_space<vmem>>, vector<1x2x8x8xf32>
    %19 = vector.shape_cast %18 : vector<1x2x8x8xf32> to vector<2x8x8xf32>
    %20 = vector.shape_cast %17 : vector<2x8x8xf32> to vector<1x2x8x8xf32>
    tpu.vector_store %arg6[%c0_14, %c0_15, %c0_16, %c0_17], %20 {strides = array<i32>} : memref<1x2x8x8xf32, #tpu.memory_space<vmem>>, vector<1x2x8x8xf32>,
    %21 = arith.truncf %17 : vector<2x8x8xf32> to vector<2x8x8xbf16>
    %cst_18 = arith.constant dense<0.000000e+00> : vector<2x8x16xf32>
    %22 = tpu.matmul %21, %7, %cst_18 {dimension_numbers = #tpu.dot_dimension_numbers<[2], [1], [1], [2], [0, 0, 0, 1, 1, 2], [0], [0]>} : vector<2x8x8xbf16>, vector<2x8x16xbf16>, vector<2x8x16xf32> -> vector<2x8x16xf32>
    %23 = vector.extract_strided_slice %22 {offsets = [0, 0, 0], sizes = [1, 8, 16], strides = [1, 1, 1]} : vector<2x8x16xf32> to vector<1x8x16xf32>
    %24 = vector.shape_cast %23 : vector<1x8x16xf32> to vector<8x16xf32>
    %c0_19 = arith.constant 0 : index
    %c0_20 = arith.constant 0 : index
    %c0_21 = arith.constant 0 : index
    %25 = vector.load %arg5[%c0_19, %c0_20, %c0_21] : memref<1x8x32xf32, #tpu.memory_space<vmem>>, vector<1x8x16xf32>
    %26 = vector.shape_cast %25 : vector<1x8x16xf32> to vector<8x16xf32>
    %27 = vector.shape_cast %24 : vector<8x16xf32> to vector<1x8x16xf32>
    tpu.vector_store %arg5[%c0_19, %c0_20, %c0_21], %27 {strides = array<i32>} : memref<1x8x32xf32, #tpu.memory_space<vmem>>, vector<1x8x16xf32>,
    %28 = vector.extract_strided_slice %22 {offsets = [1, 0, 0], sizes = [1, 8, 16], strides = [1, 1, 1]} : vector<2x8x16xf32> to vector<1x8x16xf32>
    %29 = vector.shape_cast %28 : vector<1x8x16xf32> to vector<8x16xf32>
    %c0_22 = arith.constant 0 : index
    %c0_23 = arith.constant 0 : index
    %c16 = arith.constant 16 : index
    %30 = vector.load %arg5[%c0_22, %c0_23, %c16] : memref<1x8x32xf32, #tpu.memory_space<vmem>>, vector<1x8x16xf32>
    %31 = vector.shape_cast %30 : vector<1x8x16xf32> to vector<8x16xf32>
    %32 = vector.shape_cast %29 : vector<8x16xf32> to vector<1x8x16xf32>
    tpu.vector_store %arg5[%c0_22, %c0_23, %c16], %32 {strides = array<i32>} : memref<1x8x32xf32, #tpu.memory_space<vmem>>, vector<1x8x16xf32>,
    return
  }
  func.func @transform_0(%arg0: i32, %arg1: i32) -> (i32, i32, i32, i32) {
    %c0_i32 = arith.constant 0 : i32
    %c0_i32_0 = arith.constant 0 : i32
    %c0_i32_1 = arith.constant 0 : i32
    return %arg0, %c0_i32, %arg1, %c0_i32_0 : i32, i32, i32, i32
  }
  func.func @transform_1(%arg0: i32, %arg1: i32) -> (i32, i32, i32, i32) {
    %c0_i32 = arith.constant 0 : i32
    %c0_i32_0 = arith.constant 0 : i32
    %c0_i32_1 = arith.constant 0 : i32
    %c0_i32_2 = arith.constant 0 : i32
    return %arg0, %c0_i32, %c0_i32_0, %c0_i32_1 : i32, i32, i32, i32
  }
  func.func @transform_2(%arg0: i32, %arg1: i32) -> (i32, i32, i32, i32) {
    %c0_i32 = arith.constant 0 : i32
    %c0_i32_0 = arith.constant 0 : i32
    %c0_i32_1 = arith.constant 0 : i32
    %c0_i32_2 = arith.constant 0 : i32
    return %arg0, %c0_i32, %c0_i32_0, %c0_i32_1 : i32, i32, i32, i32
  }
  func.func @transform_3(%arg0: i32, %arg1: i32) -> (i32, i32, i32) {
    %c0_i32 = arith.constant 0 : i32
    %c0_i32_0 = arith.constant 0 : i32
    return %arg0, %arg1, %c0_i32 : i32, i32, i32
  }
  func.func @transform_4(%arg0: i32, %arg1: i32) -> (i32, i32, i32, i32) {
    %c0_i32 = arith.constant 0 : i32
    %c0_i32_0 = arith.constant 0 : i32
    %c0_i32_1 = arith.constant 0 : i32
    return %arg0, %c0_i32, %arg1, %c0_i32_0 : i32, i32, i32, i32
  }
}

</mosaic_0001>

<bundles_post_ra>
// kernel: tpu_custom_call.1
= control target key start
LH: loop header
LB: loop body
LE: loop exit
PB: predicated region body
PF: predicated region fallthrough
CT: control target
= control target key end

     0   :  { %s1485_s0 = inlined_call_operand.hbm [shape: bf16[2,2,8,16], index: 0, kind: input, shape index: {}]   ;;  %s1486_s1 = inlined_call_operand.hbm [shape: bf16[2,2,8,16], index: 1, kind: input, shape index: {}]   ;;  %s1487_s2 = inlined_call_operand.hbm [shape: bf16[2,2,8,16], index: 2, kind: input, shape index: {}]   ;;  %s1488_s3 = inlined_call_operand.hbm [shape: f32[2,8,32], index: 3, kind: output, shape index: {0}]   ;;  %s1489_s4 = inlined_call_operand.hbm [shape: f32[2,2,8,8], index: 4, kind: output, shape index: {1}]  }
   0x1   :  { %1501 = sst [smem:[#allocation19_spill]] %s1486_s1 }
   0x2   :  { %10 = vsyncpa [#allocation3], 0 }
   0x3   :  { %12 = vsyncpa [#allocation3 + $0x1], 0 }
   0x4   :  { %13 = vsyncpa [#allocation6], 0 }
   0x5   :  { %15 = vsyncpa [#allocation6 + $0x1], 0 }
   0x6   :  { %16 = vsyncpa [#allocation4], 0 }
   0x7   :  { %18 = vsyncpa [#allocation4 + $0x1], 0 }
   0x8   :  { %19 = vsyncpa [#allocation10], 0 }
   0x9   :  { %21 = vsyncpa [#allocation10 + $0x1], 0  ;;  %s1153_s15 = smov 0   ;;  %s1155_s16 = smov 0  }
   0xa   :  { %s1157_s17 = smov 0   ;;  %s1159_s18 = smov 0  }
   0xb   :  { %s1161_s19 = smov 0   ;;  %s1163_s20 = smov 0  }
   0xc LB: > { %1502 = sst [smem:[#allocation15_spill]] %s1110_s19  ;;  %s1184_s21 = sadd.s32 4294967295, %s1114_s20   ;;  %s1114_s20 = sphi %s1163_s20, %s27_s20   ;;  %s1110_s19 = sphi %s1161_s19, %s1527_s19   ;;  %s1106_s18 = sphi %s1159_s18, %s1526_s18   ;;  %s1102_s17 = sphi %s1157_s17, %s1530_s17   ;;  %s1098_s16 = sphi %s1155_s16, %s1529_s16   ;;  %s1094_s15 = sphi %s1153_s15, %s1528_s15  }
   0xd   : > { %1503 = sst [smem:[#allocation16_spill]] %s1114_s20  ;;  %s749_s22 = sadd.s32 4294967294, %s1114_s20  }
   0xe   : > { %s39_s23 = sadd.s32 1, %s1110_s19  ;;  %s48_s24 = sadd.s32 1, %s1102_s17 }
   0xf   : > { %p41_p0 = scmp.ge.s32.totalorder %s39_s23, 2  ;;  %p55_p1 = scmp.ne.s32.totalorder %s1102_s17, %s1098_s16 }
  0x10   : > { %p56_p2 = scmp.eq.s32.totalorder %s1114_s20, 0  ;;  %p61_p3 = scmp.ne.s32.totalorder %s1098_s16, %s1094_s15 }
  0x11   : > { %s1532_s23 = smov (%p41_p0, %s39_s23), 0  ;;  %p62_p5 = scmp.eq.s32.totalorder %s1184_s21, 0 }
  0x12   : > { %1504 = sst [smem:[#allocation17_spill]] %s1532_s23  ;;  %p1196_p4 = por %p56_p2, %p55_p1 }
  0x13   : > { %s43_s26 = ssub.s32 %s1110_s19, %s1532_s23  ;;  %p139_p6 = scmp.eq.s32.totalorder %s1184_s21, 1 }
  0x14   : > { %p46_p7 = scmp.eq.s32.totalorder %s43_s26, 0  ;;  %p1204_p8 = por %p62_p5, %p61_p3 }
  0x15   : > { %p1208_p9 = por %p139_p6, %p55_p1  ;;  %p145_p10 = scmp.eq.s32.totalorder %s749_s22, 1 }
  0x16   : > { %s1506_s27 = scalar_select %p1204_p8, 1, 0 }
  0x17   : > { %s1507_s28 = scalar_select %p1208_p9, 1, 0 }
  0x18   : > { %s1213_s29 = scalar_select %p46_p7, %s1102_s17, %s48_s24  }
  0x19   : > { %p1215_p11 = por %p145_p10, %p61_p3  ;;  %p841_p13 = scmp.lt.s32.totalorder %s1114_s20, 2 }
  0x1a   : > { %1508 = sst [smem:[#allocation18_spill]] %s1213_s29  ;;  %s1490_s5 = sand.u32 1, %s1102_s17  }
  0x1b   : > { %s1509_s30 = scalar_select %p1215_p11, 1, 0 }
  0x1c   : > { %s1224_s6 = sshll.u32 %s1490_s5, 3  ;;  %s1227_s7 = sshll.u32 %s1110_s19, 7 }
  0x1d   : > { %p1231_p0 = pnand %p841_p13, %p1196_p4  ;;  %s215_s9 = sand.u32 1, %s1114_s20  }
  0x1e   : > { %s1511_s1 = sld [smem:[#allocation19_spill]]  ;;  %s219_s13 = scalar_lea.vmem [#allocation5], %s1224_s6 }
  0x1f   : > { %s226_s14 = sshll.u32 %s219_s13, 4  ;;  %s1247_s22 = scalar_lea.sflag [#allocation6], %s215_s9  ;;  %s1244_s14 = int_to_ptr.vmem [resolvable:$true] %s226_s14 }
  0x20   : > { %p1253_p4 = pneg %p1231_p0 }
  0x24   : > { %s1240_s12 = scalar_lea.hbm %s1511_s1, %s1227_s7  ;;  %s911_s11 = scalar_lea.hbm %s1511_s1, 256 }
  0x25   : > { %s906_s24 = scalar_lea.hbm %s1240_s12, 128  ;;  %p912_p7 = scmp.lt.u32.totalorder %s1240_s12, %s1511_s1 }
  0x26   : > { %p907_p3 = scmp.ne.s32.totalorder %s1240_s12, %s906_s24  ;;  %p913_p10 = scmp.lt.u32.totalorder %s911_s11, %s906_s24 }
  0x27   : > { %p915_p12 = scmp.lt.u32.totalorder %s906_s24, %s1240_s12 }
  0x28   : > { %p909_p5 = pnand %p1253_p4, %p907_p3  ;;  %p914_p13 = por %p913_p10, %p912_p7 }
  0x2a   : > { %p910_p6 = pneg %p909_p5  ;;  %p916_p1 = por %p915_p12, %p914_p13 }
  0x2c   : > { %p917_p2 = pnand %p916_p1, %p910_p6 }
  0x2e   : > { %920 = shalt.err (!%p917_p2)
}
  0x2f   : > { %s921_s9 = scalar_lea.vmem %s1244_s14, 128  ;;  %s1116_s26 = smov [#allocation5]  }
  0x30   : > { %p922_p3 = scmp.ne.s32.totalorder %s1244_s14, %s921_s9  ;;  %s926_s10 = sshll.u32 %s1116_s26, 4  ;;  %s927_s10 = int_to_ptr.vmem [resolvable:$false] %s926_s10 }
  0x31   : > { %s928_s5 = scalar_lea.vmem %s927_s10, 256  ;;  %p929_p9 = scmp.lt.s32.totalorder %s1244_s14, %s927_s10 }
  0x32   : > { %p924_p5 = pnand %p922_p3, %p1253_p4  ;;  %p930_p8 = scmp.lt.s32.totalorder %s928_s5, %s921_s9 }
  0x34   : > { %p925_p11 = pneg %p924_p5  ;;  %p931_p7 = por %p930_p8, %p929_p9 }
  0x36   : > { %p932_p10 = pnand %p931_p7, %p925_p11 }
  0x38   : > { %935 = shalt.err (!%p932_p10)
}
  0x39   : > { %s1493_s24 = smov 64   ;;  %s1495_s11 = smov 4  }
  0x3a   : > { %830 = dma.hbm_to_vmem [thread:$0]  (!%p1231_p0), %s1240_s12, 128, %s1244_s14, %s1247_s22, %s1493_s24, %s1493_s24, %s1495_s11  }
  0x3b   : > { %p1513_p8 = scmp.lt.s32.totalorder %s1114_s20, 3  ;;  %p1514_p9 = scmp.ge.s32.totalorder %s1114_s20, 1 }
  0x3c   : > { %s1292_s10 = scalar_lea.hbm %s1485_s0, %s1227_s7  ;;  %s197_s5 = scalar_lea.vmem [#allocation2], %s1224_s6 }
  0x3d   : > { %p1284_p11 = pnand %p1514_p9, %p1513_p8  ;;  %s205_s1 = sshll.u32 %s197_s5, 4  ;;  %s1295_s1 = int_to_ptr.vmem [resolvable:$true] %s205_s1 }
  0x3e   : > { %s1301_s24 = scalar_lea.hbm %s1487_s2, %s1227_s7  ;;  %s1516_s11 = sand.u32 1, %s1102_s17  }
  0x3f   : > { %s1515_s13 = scalar_select %p1284_p11, 1, 0 }
  0x40   : > { %s1305_s23 = scalar_lea.sflag [#allocation3], %s1516_s11  ;;  %s936_s19 = scalar_lea.hbm %s1292_s10, 128 }
  0x41   : > { %p937_p12 = scmp.ne.s32.totalorder %s1292_s10, %s936_s19  ;;  %s941_s29 = scalar_lea.hbm %s1485_s0, 256 }
  0x42   : > { %p942_p6 = scmp.lt.u32.totalorder %s1292_s10, %s1485_s0  ;;  %p943_p13 = scmp.lt.u32.totalorder %s941_s29, %s936_s19 }
  0x43   : > { %p939_p1 = pnand %p937_p12, %p1253_p4  ;;  %p945_p5 = scmp.lt.u32.totalorder %s936_s19, %s1292_s10 }
  0x44   : > { %p944_p3 = por %p943_p13, %p942_p6 }
  0x45   : > { %p940_p2 = pneg %p939_p1 }
  0x46   : > { %p946_p7 = por %p945_p5, %p944_p3 }
  0x48   : > { %p947_p10 = pnand %p946_p7, %p940_p2 }
  0x4a   : > { %950 = shalt.err (!%p947_p10)
}
  0x4b   : > { %s951_s7 = scalar_lea.vmem %s1295_s1, 128  ;;  %s1119_s11 = smov [#allocation2]  }
  0x4c   : > { %p952_p8 = scmp.ne.s32.totalorder %s1295_s1, %s951_s7  ;;  %s956_s12 = sshll.u32 %s1119_s11, 4  ;;  %s957_s12 = int_to_ptr.vmem [resolvable:$false] %s956_s12 }
  0x4d   : > { %s958_s20 = scalar_lea.vmem %s957_s12, 256  ;;  %p959_p1 = scmp.lt.s32.totalorder %s1295_s1, %s957_s12 }
  0x4e   : > { %p954_p9 = pnand %p952_p8, %p1253_p4  ;;  %p960_p11 = scmp.lt.s32.totalorder %s958_s20, %s951_s7 }
  0x50   : > { %p955_p12 = pneg %p954_p9  ;;  %p961_p6 = por %p960_p11, %p959_p1 }
  0x52   : > { %p962_p13 = pnand %p961_p6, %p955_p12 }
  0x54   : > { %965 = shalt.err (!%p962_p13)
}
  0x55   : > { %s1517_s19 = smov 4   ;;  %s1518_s29 = smov 64  }
  0x56   : > { %827 = dma.hbm_to_vmem [thread:$0]  (!%p1231_p0), %s1292_s10, 128, %s1295_s1, %s1305_s23, %s1518_s29, %s1518_s29, %s1517_s19  }
  0x57   : > { %s240_s14 = scalar_lea.vmem [#allocation7], %s1224_s6  ;;  %s966_s26 = scalar_lea.hbm %s1301_s24, 128 }
  0x58   : > { %s247_s9 = sshll.u32 %s240_s14, 4  ;;  %p967_p11 = scmp.ne.s32.totalorder %s1301_s24, %s966_s26  ;;  %s1333_s9 = int_to_ptr.vmem [resolvable:$true] %s247_s9 }
  0x59   : > { %s971_s11 = scalar_lea.hbm %s1487_s2, 256  ;;  %p972_p5 = scmp.lt.u32.totalorder %s1301_s24, %s1487_s2 }
  0x5a   : > { %p969_p2 = pnand %p967_p11, %p1253_p4  ;;  %p973_p7 = scmp.lt.u32.totalorder %s971_s11, %s966_s26 }
  0x5b   : > { %p975_p8 = scmp.lt.u32.totalorder %s966_s26, %s1301_s24 }
  0x5c   : > { %p970_p3 = pneg %p969_p2  ;;  %p974_p10 = por %p973_p7, %p972_p5 }
  0x5e   : > { %p976_p9 = por %p975_p8, %p974_p10 }
  0x60   : > { %p977_p12 = pnand %p976_p9, %p970_p3 }
  0x62   : > { %980 = shalt.err (!%p977_p12)
}
  0x63   : > { %s981_s1 = scalar_lea.vmem %s1333_s9, 128  ;;  %s1120_s23 = smov [#allocation7]  }
  0x64   : > { %p982_p1 = scmp.ne.s32.totalorder %s1333_s9, %s981_s1  ;;  %s986_s6 = sshll.u32 %s1120_s23, 4  ;;  %s987_s6 = int_to_ptr.vmem [resolvable:$false] %s986_s6 }
  0x65   : > { %s988_s10 = scalar_lea.vmem %s987_s6, 256  ;;  %p989_p11 = scmp.lt.s32.totalorder %s1333_s9, %s987_s6 }
  0x66   : > { %p984_p6 = pnand %p982_p1, %p1253_p4  ;;  %p990_p2 = scmp.lt.s32.totalorder %s988_s10, %s981_s1 }
  0x68   : > { %p985_p13 = pneg %p984_p6  ;;  %p991_p5 = por %p990_p2, %p989_p11 }
  0x6a   : > { %p992_p7 = pnand %p991_p5, %p985_p13 }
  0x6c   : > { %995 = shalt.err (!%p992_p7)
}
  0x6d   : > { %833 = dma.hbm_to_vmem [thread:$0]  (!%p1231_p0), %s1301_s24, 128, %s1333_s9, %s1247_s22, %s1518_s29, %s1518_s29, %s1517_s19  }
  0x6e   : > { %p1519_p4 = scmp.ne.s32.totalorder %s1515_s13, 0 }
  0x6f   : > { %s1363_s25 = sand.u32 (!%p1519_p4), 1, %s1098_s16   ;;  %p1520_p3 = scmp.ne.s32.totalorder (!%p1519_p4), %s1506_s27, 0 }
  0x70   : > { %259 = sbr.rel (%p1519_p4) target bundleno = 1002 (0x3ea), region = 32  ;;  %s1366_s14 = sshll.u32 (!%p1519_p4), %s1363_s25, 3 }
  0x71   : > { %s262_s8 = scalar_lea.sflag (!%p1519_p4), [#allocation3], %s1363_s25  ;;  %s265_s26 = scalar_lea.vmem (!%p1519_p4), [#allocation2], %s1366_s14 }
  0x77   : > { %1077 = dma.done.wait (%p1520_p3), %s262_s8, 128  }
  0x78   : > { %1079 = vsyncadd (%p1520_p3), %s262_s8, 4294967168  ;;  %s270_s22 = sand.u32 1, %s1184_s21   ;;  %s274_s13 = scalar_lea.vmem [#allocation5], %s1366_s14 }
  0x79   : > { %s271_s24 = scalar_lea.sflag [#allocation6], %s270_s22 }
  0x7a   : > { %1081 = dma.done.wait (%p1520_p3), %s271_s24, 256  }
  0x7b   : > { %1083 = vsyncadd (%p1520_p3), %s271_s24, 4294967040  ;;  %v1121_v0 = vmov 0.0   ;;  %vm1122_vm0 = vmmov 0   ;;  %vm333_vm1 = vcmask 130048   ;;  %v330_v1 = vld [vmem:[%s274_s13 + $0x4] sm:$0xf] }
  0x7c   : > { %796 = vmatprep.subr.bf16.mxu1 %v1121_v0  ;;  %790 = vmatprep.subr.bf16.mxu0 %v1121_v0  ;;  %v329_v2 = vld [vmem:[%s274_s13] sm:$0xf]  ;;  %v384_v3 = vsel %vm333_vm1, %v330_v1, 0  ;;  %v326_v5 = vld [vmem:[%s265_s26 + $0x4] sm:$0xf]  ;;  %vm426_vm2 = vcmask 64512  }
  0x7d   : > { %798 = vmatprep.mubr.msk.bf16.mxu1 %vm1122_vm0, %v1121_v0  ;;  %792 = vmatprep.mubr.msk.bf16.mxu0 %vm1122_vm0, %v1121_v0  ;;  %v338_v4 = vsel %vm333_vm1, %v329_v2, 0  ;;  %v325_v6 = vld [vmem:[%s265_s26] sm:$0xf]  ;;  %v328_v7 = vmul.bf16 1048592000, %v326_v5  ;;  %s283_s21 = scalar_lea.vmem [#allocation7], %s1366_s14 }
  0x7e   : > { %797 = vmatpush3.bf16.xpose.msra.mxu1 %v384_v3  ;;  %791 = vmatpush3.bf16.xpose.msra.mxu0 %v338_v4  ;;  %v327_v8 = vmul.bf16 1048592000, %v325_v6  ;;  %v332_v29 = vld [vmem:[%s283_s21 + $0x4] sm:$0xf]  ;;  %vm456_vm3 = vcmask 1043456   ;;  %s766_s27 = sshll.u32 %s1363_s25, 4 }
  0x7f   : > { %808 = vmatprep.subr.bf16.mxu1 %v1121_v0  ;;  %802 = vmatprep.subr.bf16.mxu0 %v1121_v0  ;;  %v504_v30 = vsel %vm456_vm3, %v332_v29, 0  ;;  %v331_v31 = vld [vmem:[%s283_s21] sm:$0xf]  ;;  %s322_s19 = scalar_lea.vmem [#allocation9], %s766_s27  ;;  %s781_s29 = sshll.u32 %s1106_s18, 8 }
  0x80   : > { %v458_v32 = vsel %vm456_vm3, %v331_v31, 0  ;;  %s587_s9 = sshll.u32 %s322_s19, 4  ;;  %s1402_s11 = scalar_lea.hbm %s1489_s4, %s781_s29  ;;  %s1404_s9 = int_to_ptr.vmem [resolvable:$true] %s587_s9 }
  0x81   : > { %s559_s12 = scalar_lea.sflag [#allocation10], %s1363_s25  ;;  %s996_s20 = scalar_lea.vmem %s1404_s9, 256 }
  0x82   : > { %p997_p0 = scmp.ne.s32.totalorder %s1404_s9, %s996_s20  ;;  %p1521_p10 = scmp.ne.s32.totalorder %s1507_s28, 0 }
  0x83   : > { %s1123_s1 = smov [#allocation9]  }
  0x84   : > { %p998_p8 = pnand %p997_p0, %p1521_p10  ;;  %s1000_s23 = sshll.u32 %s1123_s1, 4  ;;  %s1001_s23 = int_to_ptr.vmem [resolvable:$false] %s1000_s23 }
  0x85   : > { %799 = vmatmul.mubr.msk.bf16.vlgmr.msra.gmra.mrb[0].mxu1 %vm333_vm1, %v328_v7  ;;  %793 = vmatmul.mubr.msk.bf16.vlgmr.msra.gmra.mrb[0].mxu0 %vm333_vm1, %v327_v8  ;;  %s1002_s6 = scalar_lea.vmem %s1001_s23, 512  ;;  %p1003_p12 = scmp.lt.s32.totalorder %s1404_s9, %s1001_s23 }
  0x86   : > { %810 = vmatprep.mubr.msk.bf16.mxu1 %vm1122_vm0, %v1121_v0  ;;  %804 = vmatprep.mubr.msk.bf16.mxu0 %vm1122_vm0, %v1121_v0  ;;  %p999_p9 = pneg %p998_p8  ;;  %p1004_p1 = scmp.lt.s32.totalorder %s1002_s6, %s996_s20 }
  0x87   : > { %809 = vmatpush3.bf16.msra.mxu1 %v504_v30  ;;  %803 = vmatpush3.bf16.msra.mxu0 %v458_v32 }
  0x88   : > { %p1005_p6 = por %p1004_p1, %p1003_p12 }
  0x8a   : > { %p1006_p13 = pnand %p1005_p6, %p999_p9 }
 0x158   : > { %v420_v9 = vpop.f32.mrb[0].mxu1  ;;  %v374_v10 = vpop.f32.mrb[0].mxu0 }
 0x159   : > { %v800_v11 = vpop.f32.mrb[1].mxu1  ;;  %v430_v12 = vsel %vm426_vm2, %v420_v9, -inf  ;;  %v794_v13 = vpop.f32.mrb[1].mxu0  ;;  %v427_v17 = vsel %vm426_vm2, %v374_v10, -inf }
 0x15a   : > { %431 = vmax.xlane.f32.xlu0 %v430_v12  ;;  %v423_v14 = vpop.f32.mrb[2].mxu1  ;;  %v377_v15 = vpop.f32.mrb[2].mxu0 }
 0x15b   : > { %v801_v16 = vpop.f32.mrb[3].mxu1  ;;  %v795_v18 = vpop.f32.mrb[3].mxu0 }
 0x15e   : > { %428 = vmax.xlane.f32.xlu0 %v427_v17 }
 0x1e7   : > { %v432_v19 = vpop.xlane.xlu0 %431 }
 0x1e8   : > { %v434_v20 = vsub.f32 %v420_v9, %v432_v19 }
 0x1ea   : > { %v437_v21 = vmul.f32 1.442695, %v434_v20 }
 0x1eb   : > { %v429_v22 = vpop.xlane.xlu0 %428 }
 0x1ec   : > { %898 = vpow2.f32 %v437_v21  ;;  %v433_v23 = vsub.f32 %v374_v10, %v429_v22 }
 0x1ee   : > { %v435_v24 = vmul.f32 1.442695, %v433_v23 }
 0x1f0   : > { %900 = vpow2.f32 %v435_v24 }
 0x1f6   : > { %v899_v25 = vpop.eup %898 }
 0x1f7   : > { %v442_v26 = vsel %vm426_vm2, %v899_v25, 0.0 }
 0x1f8   : > { %443 = vadd.xlane.f32.xlu1 %v442_v26 }
 0x1fa   : > { %v901_v27 = vpop.eup %900 }
 0x1fb   : > { %v439_v28 = vsel %vm426_vm2, %v901_v27, 0.0 }
 0x1fc   : > { %440 = vadd.xlane.f32.xlu1 %v439_v28 }
 0x285   : > { %v444_v33 = vpop.xlane.xlu1 %443 }
 0x286   : > { %902 = vrcp.f32 %v444_v33 }
 0x289   : > { %v441_v34 = vpop.xlane.xlu1 %440 }
 0x28a   : > { %904 = vrcp.f32 %v441_v34 }
 0x290   : > { %v903_v35 = vpop.eup %902 }
 0x291   : > { %v448_v36 = vmul.f32 %v903_v35, %v899_v25 }
 0x293   : > { %v452_v37 = vpack.c.bf16 %v448_v36, %v448_v36  ;;  %450 = vst.msk [vmem:[%s322_s19 + $0x8] sm:$0xff] %vm426_vm2, %v448_v36 }
 0x294   : > { %v905_v38 = vpop.eup %904 }
 0x295   : > { %v446_v39 = vmul.f32 %v905_v38, %v901_v27  ;;  %811 = vmatmul.mubr.msk.bf16.vlgmr.msra.gmra.mrb[4].mxu1 %vm426_vm2, %v452_v37 }
 0x297   : > { %v451_v40 = vpack.c.bf16 %v446_v39, %v446_v39  ;;  %449 = vst.msk [vmem:[%s322_s19] sm:$0xff] %vm426_vm2, %v446_v39 }
 0x299   : > { %805 = vmatmul.mubr.msk.bf16.vlgmr.msra.gmra.mrb[4].mxu0 %vm426_vm2, %v451_v40 }
 0x29a   : > { %1009 = shalt.err (!%p1006_p13)
}
 0x29b   : > { %s1010_s10 = scalar_lea.hbm %s1402_s11, 256  ;;  %s1014_s22 = scalar_lea.hbm %s1489_s4, 512 }
 0x29c   : > { %p1011_p11 = scmp.ne.s32.totalorder %s1402_s11, %s1010_s10  ;;  %p1015_p7 = scmp.lt.u32.totalorder %s1402_s11, %s1489_s4 }
 0x29d   : > { %p1016_p4 = scmp.lt.u32.totalorder %s1014_s22, %s1010_s10  ;;  %p1018_p0 = scmp.lt.u32.totalorder %s1010_s10, %s1402_s11 }
 0x29e   : > { %p1012_p2 = pnand %p1011_p11, %p1521_p10 }
 0x29f   : > { %p1017_p3 = por %p1016_p4, %p1015_p7 }
 0x2a0   : > { %p1013_p5 = pneg %p1012_p2 }
 0x2a1   : > { %p1019_p8 = por %p1018_p0, %p1017_p3 }
 0x2a3   : > { %p1020_p9 = pnand %p1019_p8, %p1013_p5 }
 0x2a5   : > { %1023 = shalt.err (!%p1020_p9)
}
 0x2a6   : > { %s1124_s21 = smov 128   ;;  %s1125_s27 = smov 8   ;;  %vm551_vm4 = vcmask 261248  }
 0x2a7   : > { %821 = dma.vmem_to_hbm [thread:$0]  (%p1521_p10), %s1404_s9, 256, %s1402_s11, %s559_s12, %s1124_s21, %s1124_s21, %s1125_s27  }
 0x2a8   : > { %s1126_s19 = smov 16   ;;  %s315_s29 = scalar_lea.vmem [#allocation8], %s1366_s14 }
 0x2a9   : > { %s773_s5 = sshll.u32 %s1106_s18, 7  ;;  %s573_s7 = sshll.u32 %s315_s29, 4  ;;  %s1438_s7 = int_to_ptr.vmem [resolvable:$true] %s573_s7 }
 0x2aa   : > { %s1436_s11 = scalar_lea.hbm %s1488_s3, %s773_s5  ;;  %s554_s14 = scalar_lea.sflag [#allocation4], %s1363_s25 }
 0x2ab   : > { %s1024_s12 = scalar_lea.vmem %s1438_s7, 128  ;;  %s1127_s18 = smov [#allocation8]  }
 0x2ac   : > { %p1025_p12 = scmp.ne.s32.totalorder %s1438_s7, %s1024_s12  ;;  %s1028_s1 = sshll.u32 %s1127_s18, 4  ;;  %s1029_s1 = int_to_ptr.vmem [resolvable:$false] %s1028_s1 }
 0x2ad   : > { %s1030_s23 = scalar_lea.vmem %s1029_s1, 256  ;;  %p1031_p13 = scmp.lt.s32.totalorder %s1438_s7, %s1029_s1 }
 0x2ae   : > { %p1026_p1 = pnand %p1025_p12, %p1521_p10  ;;  %p1032_p11 = scmp.lt.s32.totalorder %s1030_s23, %s1024_s12 }
 0x2b0   : > { %p1027_p6 = pneg %p1026_p1  ;;  %p1033_p2 = por %p1032_p11, %p1031_p13 }
 0x2b2   : > { %p1034_p5 = pnand %p1033_p2, %p1027_p6 }
 0x368   : > { %v540_v41 = vpop.f32.mrb[4].mxu1 }
 0x369   : > { %v812_v42 = vpop.f32.mrb[5].mxu1  ;;  %548 = vrot.lane.b32.xlu0 %v540_v41, %s1126_s19 }
 0x36a   : > { %v543_v43 = vpop.f32.mrb[6].mxu1 }
 0x36b   : > { %v813_v44 = vpop.f32.mrb[7].mxu1 }
 0x36c   : > { %v494_v45 = vpop.f32.mrb[4].mxu0 }
 0x36d   : > { %546 = vst.msk [vmem:[%s315_s29] sm:$0xff] %vm333_vm1, %v494_v45  ;;  %v806_v46 = vpop.f32.mrb[5].mxu0 }
 0x36e   : > { %v497_v47 = vpop.f32.mrb[6].mxu0 }
 0x36f   : > { %v807_v48 = vpop.f32.mrb[7].mxu0 }
 0x3db   : > { %v549_v49 = vpop.permute.xlu0 %548 }
 0x3dc   : > { %552 = vst.msk [vmem:[%s315_s29] sm:$0xff] %vm551_vm4, %v549_v49 }
 0x3dd   : > { %1037 = shalt.err (!%p1034_p5)
}
 0x3de   : > { %s1038_s25 = scalar_lea.hbm %s1436_s11, 128  ;;  %s1042_s8 = scalar_lea.hbm %s1488_s3, 256 }
 0x3df   : > { %p1039_p7 = scmp.ne.s32.totalorder %s1436_s11, %s1038_s25  ;;  %p1043_p0 = scmp.lt.u32.totalorder %s1436_s11, %s1488_s3 }
 0x3e0   : > { %p1044_p8 = scmp.lt.u32.totalorder %s1042_s8, %s1038_s25  ;;  %p1046_p12 = scmp.lt.u32.totalorder %s1038_s25, %s1436_s11 }
 0x3e1   : > { %p1040_p4 = pnand %p1039_p7, %p1521_p10 }
 0x3e2   : > { %p1045_p9 = por %p1044_p8, %p1043_p0 }
 0x3e3   : > { %p1041_p3 = pneg %p1040_p4 }
 0x3e4   : > { %p1047_p1 = por %p1046_p12, %p1045_p9 }
 0x3e6   : > { %p1048_p6 = pnand %p1047_p1, %p1041_p3 }
 0x3e8   : > { %1051 = shalt.err (!%p1048_p6)
}
 0x3e9   : > { %820 = dma.vmem_to_hbm [thread:$0]  (%p1521_p10), %s1438_s7, 128, %s1436_s11, %s554_s14  }
 0x3ea PF: > { %s1522_s24 = sld [smem:[#allocation16_spill]]  ;;  %s602_s13 = sand.u32 1, %s1094_s15  }
 0x3eb   : > { %p1523_p13 = scmp.ne.s32.totalorder %s1509_s30, 0  ;;  %s603_s21 = scalar_lea.sflag [#allocation4], %s602_s13 }
 0x3f0   : > { %p1524_p11 = scmp.ge.s32.totalorder %s1522_s24, 2 }
 0x3f2   : > { %p835_p2 = pnand %p1524_p11, %p1523_p13 }
 0x3f4   : > { %1085 = dma.done.wait (!%p835_p2), %s603_s21, 128  }
 0x3f5   : > { %1087 = vsyncadd (!%p835_p2), %s603_s21, 4294967168  ;;  %s612_s27 = scalar_lea.sflag [#allocation10], %s602_s13 }
 0x3f6   : > { %1089 = dma.done.wait (!%p835_p2), %s612_s27, 256  }
 0x3f7   : > { %1091 = vsyncadd (!%p835_p2), %s612_s27, 4294967040  ;;  %s27_s20 = sadd.s32 1, %s1522_s24   ;;  %s1525_s28 = sld [smem:[#allocation18_spill]] }
 0x3f8   : > { %p24_p5 = scmp.ge.s32.totalorder %s27_s20, 4   ;;  %s1526_s18 = sld [smem:[#allocation15_spill]] }
 0x3f9   : > { %s1527_s19 = sld [smem:[#allocation17_spill]]  ;;  %s1528_s15 = smov %s1098_s16 }
 0x3fa   : > { %s1529_s16 = smov %s1102_s17  ;;  %26 = sbr.rel (!%p24_p5) target bundleno = 12 (0xc), region = 118 }
 0x3fd   : > { %s1530_s17 = smov %s1525_s28 }
 0x401   :  { %617 = vsyncpa [#allocation3], 1 }
 0x402   :  { %619 = vsyncpa [#allocation3 + $0x1], 1 }
 0x403   :  { %620 = vsyncpa [#allocation6], 1 }
 0x404   :  { %622 = vsyncpa [#allocation6 + $0x1], 1 }
 0x405   :  { %623 = vsyncpa [#allocation4], 1 }
 0x406   :  { %625 = vsyncpa [#allocation4 + $0x1], 1 }
 0x407   :  { %626 = vsyncpa [#allocation10], 1 }
 0x408   :  { %628 = vsyncpa [#allocation10 + $0x1], 1 }

</bundles_post_ra>
